<compile_context>
chip_gen: v7x
topology: tpu7x:2x2x1
jax: 0.10.0
libtpu: 0.0.40
codegen_flags: <defaults>
</compile_context>

<pallas_src>
import jax
import jax.numpy as jnp
from jax.experimental import pallas as pl
from jax.experimental.pallas import tpu as pltpu


# ----------------------------------------------------------------------------
# Fused Pallas kernel: user GAT + service GAT + gather + interaction MLP
# ----------------------------------------------------------------------------
def fused_gatcf_kernel(u_embed_ref, u_w_ref, u_a_src_ref, u_a_dst_ref, u_adj_ref,
                       s_embed_ref, s_w_ref, s_a_src_ref, s_a_dst_ref, s_adj_ref,
                       u_idx_ref, s_idx_ref,
                       w1_ref, b1_ref, w2_ref, b2_ref,
                       hidden_ref, est_ref):
    def gat(x, w, a_src_row, a_dst_row, adj):
        # Node projection on the MXU.
        h = jnp.dot(x, w, preferred_element_type=jnp.float32)              # (N, D)
        # Attention logits: VPU broadcast-multiply + row reduce
        # (avoids two near-empty (N,D)x(D,1) MXU pushes).
        f_src = jnp.sum(h * a_src_row, axis=-1, keepdims=True)             # (N, 1)
        f_dst = jnp.sum(h * a_dst_row, axis=-1, keepdims=True)             # (N, 1)
        e = f_src + f_dst.T                                                 # (N, N)
        e = jnp.where(e > 0, e, 0.2 * e)                                    # LeakyReLU(0.2)
        mask = adj > 0.0
        e = jnp.where(mask, e, jnp.float32(-1e9))
        e = e - jnp.max(e, axis=-1, keepdims=True)
        p = jnp.exp(e)                                    # masked entries underflow to exactly 0
        denom = jnp.maximum(jnp.sum(p, axis=-1, keepdims=True), 1e-20)      # guard empty rows
        alpha = p * pl.reciprocal(denom, approx=True)                       # EUP reciprocal
        out = jnp.dot(alpha, h, preferred_element_type=jnp.float32)         # (N, D)
        # ELU
        return jnp.where(out > 0, out, jnp.exp(jnp.minimum(out, 0.0)) - 1.0)

    u_feats = gat(u_embed_ref[...], u_w_ref[...], u_a_src_ref[...],
                  u_a_dst_ref[...], u_adj_ref[...])                          # (NU, D)
    s_feats = gat(s_embed_ref[...], s_w_ref[...], s_a_src_ref[...],
                  s_a_dst_ref[...], s_adj_ref[...])                          # (NS, D)

    # In-kernel batch gather via one-hot matmul (no dynamic indexing needed).
    b = u_idx_ref.shape[0]
    nu = u_feats.shape[0]
    ns = s_feats.shape[0]
    iota_u = jax.lax.broadcasted_iota(jnp.int32, (b, nu), 1)
    iota_s = jax.lax.broadcasted_iota(jnp.int32, (b, ns), 1)
    oh_u = (iota_u == u_idx_ref[...]).astype(jnp.float32)                    # (B, NU)
    oh_s = (iota_s == s_idx_ref[...]).astype(jnp.float32)                    # (B, NS)
    u_rows = jnp.dot(oh_u, u_feats, preferred_element_type=jnp.float32)      # (B, D)
    s_rows = jnp.dot(oh_s, s_feats, preferred_element_type=jnp.float32)      # (B, D)

    hidden = jnp.concatenate([u_rows, s_rows], axis=-1)                      # (B, 2D)
    hidden_ref[...] = hidden

    # Interaction MLP: ReLU(Linear) -> Linear.
    z = jnp.dot(hidden, w1_ref[...], preferred_element_type=jnp.float32) + b1_ref[...]
    z = jnp.maximum(z, 0.0)                                                  # (B, D)
    # Final (D -> 1) projection as a VPU reduce; lane-dense (1, B) output.
    est_col = jnp.sum(z * w2_ref[...], axis=-1, keepdims=True) + b2_ref[...]  # (B, 1)
    est_ref[...] = est_col.T                                                  # (1, B)


# ----------------------------------------------------------------------------
# Wrapper (single pallas_call, whole-array VMEM residency)
# ----------------------------------------------------------------------------
def gatcf_forward(params, user_idx, serv_idx):
    batch = user_idx.shape[0]
    dim = params["user_w"].shape[0]
    u_idx = user_idx.reshape(batch, 1).astype(jnp.int32)
    s_idx = serv_idx.reshape(batch, 1).astype(jnp.int32)

    vmem = pl.BlockSpec(memory_space=pltpu.MemorySpace.VMEM)
    hidden, est = pl.pallas_call(
        fused_gatcf_kernel,
        out_shape=(jax.ShapeDtypeStruct((batch, 2 * dim), jnp.float32),
                   jax.ShapeDtypeStruct((1, batch), jnp.float32)),
        in_specs=[vmem] * 16,
        out_specs=(vmem, vmem),
    )(params["user_embed"], params["user_w"], params["user_a_src"],
      params["user_a_dst"], params["user_adj"],
      params["serv_embed"], params["serv_w"], params["serv_a_src"],
      params["serv_a_dst"], params["serv_adj"],
      u_idx, s_idx,
      params["w1"], params["b1"], params["w2"], params["b2"])
    return hidden, est.reshape(-1)                                           # estimated.flatten()


model_forward = jax.jit(gatcf_forward)


# ----------------------------------------------------------------------------
# Deterministic parameter / input construction
# ----------------------------------------------------------------------------
def build_params(user_num, serv_num, dim, key):
    ks = jax.random.split(key, 10)
    scale = 0.1

    def ring_adj(n):
        eye = jnp.eye(n, dtype=jnp.float32)
        ring = jnp.roll(eye, 1, axis=1) + jnp.roll(eye, -1, axis=1)
        return jnp.clip(eye + ring, 0.0, 1.0)

    return {
        "user_embed": scale * jax.random.normal(ks[0], (user_num, dim), jnp.float32),
        "serv_embed": scale * jax.random.normal(ks[1], (serv_num, dim), jnp.float32),
        "user_w": scale * jax.random.normal(ks[2], (dim, dim), jnp.float32),
        "serv_w": scale * jax.random.normal(ks[3], (dim, dim), jnp.float32),
        # attention vectors stored as (1, D) rows for VPU broadcast-reduce
        "user_a_src": scale * jax.random.normal(ks[4], (1, dim), jnp.float32),
        "user_a_dst": scale * jax.random.normal(ks[5], (1, dim), jnp.float32),
        "serv_a_src": scale * jax.random.normal(ks[6], (1, dim), jnp.float32),
        "serv_a_dst": scale * jax.random.normal(ks[7], (1, dim), jnp.float32),
        "user_adj": ring_adj(user_num),
        "serv_adj": ring_adj(serv_num),
        "w1": scale * jax.random.normal(ks[8], (2 * dim, dim), jnp.float32),
        "b1": jnp.zeros((1, dim), jnp.float32),
        # final projection stored as (1, D) row for VPU reduce
        "w2": scale * jax.random.normal(ks[9], (1, dim), jnp.float32),
        "b2": jnp.zeros((1, 1), jnp.float32),
    }


if __name__ == "__main__":
    # TODO(synk): GATCF / ErrorCompensation source not provided; this implements a
    # standard single-head GATCF forward (GAT on user & service graphs + interaction MLP).
    USER_NUM, SERV_NUM, DIM, BATCH = 32, 32, 32, 8

    key = jax.random.PRNGKey(0)
    k_params, k_u, k_s = jax.random.split(key, 3)
    params = build_params(USER_NUM, SERV_NUM, DIM, k_params)

    user_idx = jax.random.randint(k_u, (BATCH,), 0, USER_NUM, dtype=jnp.int32)
    serv_idx = jax.random.randint(k_s, (BATCH,), 0, SERV_NUM, dtype=jnp.int32)

    hidden, estimated = model_forward(params, user_idx, serv_idx)
    jax.block_until_ready((hidden, estimated))

    assert hidden.shape == (BATCH, 2 * DIM), hidden.shape
    assert estimated.shape == (BATCH,), estimated.shape
    assert bool(jnp.all(jnp.isfinite(hidden))) and bool(jnp.all(jnp.isfinite(estimated)))
    print("KERNEL_OK")
</pallas_src>

<mosaic_0001>
module attributes {stable_mosaic.version = 11 : i64} {
  func.func @fused_gatcf_kernel(%arg0: memref<32x32xf32, #tpu.memory_space<vmem>>, %arg1: memref<32x32xf32, #tpu.memory_space<vmem>>, %arg2: memref<1x32xf32, #tpu.memory_space<vmem>>, %arg3: memref<1x32xf32, #tpu.memory_space<vmem>>, %arg4: memref<32x32xf32, #tpu.memory_space<vmem>>, %arg5: memref<32x32xf32, #tpu.memory_space<vmem>>, %arg6: memref<32x32xf32, #tpu.memory_space<vmem>>, %arg7: memref<1x32xf32, #tpu.memory_space<vmem>>, %arg8: memref<1x32xf32, #tpu.memory_space<vmem>>, %arg9: memref<32x32xf32, #tpu.memory_space<vmem>>, %arg10: memref<8x1xi32, #tpu.memory_space<vmem>>, %arg11: memref<8x1xi32, #tpu.memory_space<vmem>>, %arg12: memref<64x32xf32, #tpu.memory_space<vmem>>, %arg13: memref<1x32xf32, #tpu.memory_space<vmem>>, %arg14: memref<1x32xf32, #tpu.memory_space<vmem>>, %arg15: memref<1x1xf32, #tpu.memory_space<vmem>>, %arg16: memref<8x64xf32, #tpu.memory_space<vmem>>, %arg17: memref<1x8xf32, #tpu.memory_space<vmem>>) attributes {dimension_semantics = [], scalar_prefetch = 0 : i64, scratch_operands = 0 : i64, tpu.core_type = #tpu.core_type<tc>} {
    %c0 = arith.constant 0 : index
    %c0_0 = arith.constant 0 : index
    %0 = vector.load %arg0[%c0, %c0_0] : memref<32x32xf32, #tpu.memory_space<vmem>>, vector<32x32xf32>
    %c0_1 = arith.constant 0 : index
    %c0_2 = arith.constant 0 : index
    %1 = vector.load %arg1[%c0_1, %c0_2] : memref<32x32xf32, #tpu.memory_space<vmem>>, vector<32x32xf32>
    %c0_3 = arith.constant 0 : index
    %c0_4 = arith.constant 0 : index
    %2 = vector.load %arg2[%c0_3, %c0_4] : memref<1x32xf32, #tpu.memory_space<vmem>>, vector<1x32xf32>
    %c0_5 = arith.constant 0 : index
    %c0_6 = arith.constant 0 : index
    %3 = vector.load %arg3[%c0_5, %c0_6] : memref<1x32xf32, #tpu.memory_space<vmem>>, vector<1x32xf32>
    %c0_7 = arith.constant 0 : index
    %c0_8 = arith.constant 0 : index
    %4 = vector.load %arg4[%c0_7, %c0_8] : memref<32x32xf32, #tpu.memory_space<vmem>>, vector<32x32xf32>
    %cst = arith.constant dense<0.000000e+00> : vector<32x32xf32>
    %5 = tpu.matmul %0, %1, %cst {dimension_numbers = #tpu.dot_dimension_numbers<[1], [0], [0], [1], [0, 0, 1, 1], [], []>} : vector<32x32xf32>, vector<32x32xf32>, vector<32x32xf32> -> vector<32x32xf32>
    %6 = vector.broadcast %2 : vector<1x32xf32> to vector<32x32xf32>
    %7 = arith.mulf %5, %6 : vector<32x32xf32>
    %cst_9 = arith.constant dense<0.000000e+00> : vector<32xf32>
    %8 = vector.multi_reduction <add>, %7, %cst_9 [1] : vector<32x32xf32> to vector<32xf32>
    %9 = vector.shape_cast %8 : vector<32xf32> to vector<32x1xf32>
    %10 = vector.broadcast %3 : vector<1x32xf32> to vector<32x32xf32>
    %11 = arith.mulf %5, %10 : vector<32x32xf32>
    %cst_10 = arith.constant dense<0.000000e+00> : vector<32xf32>
    %12 = vector.multi_reduction <add>, %11, %cst_10 [1] : vector<32x32xf32> to vector<32xf32>
    %13 = vector.shape_cast %12 : vector<32xf32> to vector<32x1xf32>
    %14 = tpu.transpose %13, [1, 0] : vector<32x1xf32> -> vector<1x32xf32>
    %15 = vector.broadcast %9 : vector<32x1xf32> to vector<32x32xf32>
    %16 = vector.broadcast %14 : vector<1x32xf32> to vector<32x32xf32>
    %17 = arith.addf %15, %16 : vector<32x32xf32>
    %cst_11 = arith.constant 0.000000e+00 : f32
    %18 = vector.broadcast %cst_11 : f32 to vector<32x32xf32>
    %19 = arith.cmpf ogt, %17, %18 : vector<32x32xf32>
    %cst_12 = arith.constant 2.000000e-01 : f32
    %20 = vector.broadcast %cst_12 : f32 to vector<32x32xf32>
    %21 = arith.mulf %20, %17 : vector<32x32xf32>
    %22 = arith.select %19, %17, %21 : vector<32x32xi1>, vector<32x32xf32>
    %cst_13 = arith.constant 0.000000e+00 : f32
    %23 = vector.broadcast %cst_13 : f32 to vector<32x32xf32>
    %24 = arith.cmpf ogt, %4, %23 : vector<32x32xf32>
    %cst_14 = arith.constant -1.000000e+09 : f32
    %25 = vector.broadcast %cst_14 : f32 to vector<32x32xf32>
    %26 = arith.select %24, %22, %25 : vector<32x32xi1>, vector<32x32xf32>
    %cst_15 = arith.constant dense<0xFF800000> : vector<32xf32>
    %27 = vector.multi_reduction <maximumf>, %26, %cst_15 [1] : vector<32x32xf32> to vector<32xf32>
    %28 = vector.shape_cast %27 : vector<32xf32> to vector<32x1xf32>
    %29 = vector.broadcast %28 : vector<32x1xf32> to vector<32x32xf32>
    %30 = arith.subf %26, %29 : vector<32x32xf32>
    %31 = math.exp %30 : vector<32x32xf32>
    %cst_16 = arith.constant dense<0.000000e+00> : vector<32xf32>
    %32 = vector.multi_reduction <add>, %31, %cst_16 [1] : vector<32x32xf32> to vector<32xf32>
    %33 = vector.shape_cast %32 : vector<32xf32> to vector<32x1xf32>
    %cst_17 = arith.constant 9.99999968E-21 : f32
    %34 = vector.broadcast %cst_17 : f32 to vector<32x1xf32>
    %35 = arith.maximumf %33, %34 : vector<32x1xf32>
    %36 = tpu.reciprocal %35 {approx = true} : vector<32x1xf32> -> vector<32x1xf32>
    %37 = vector.broadcast %36 : vector<32x1xf32> to vector<32x32xf32>
    %38 = arith.mulf %31, %37 : vector<32x32xf32>
    %cst_18 = arith.constant dense<0.000000e+00> : vector<32x32xf32>
    %39 = tpu.matmul %38, %5, %cst_18 {dimension_numbers = #tpu.dot_dimension_numbers<[1], [0], [0], [1], [0, 0, 1, 1], [], []>} : vector<32x32xf32>, vector<32x32xf32>, vector<32x32xf32> -> vector<32x32xf32>
    %cst_19 = arith.constant 0.000000e+00 : f32
    %40 = vector.broadcast %cst_19 : f32 to vector<32x32xf32>
    %41 = arith.cmpf ogt, %39, %40 : vector<32x32xf32>
    %cst_20 = arith.constant 0.000000e+00 : f32
    %42 = vector.broadcast %cst_20 : f32 to vector<32x32xf32>
    %43 = arith.minimumf %39, %42 : vector<32x32xf32>
    %44 = math.exp %43 : vector<32x32xf32>
    %cst_21 = arith.constant 1.000000e+00 : f32
    %45 = vector.broadcast %cst_21 : f32 to vector<32x32xf32>
    %46 = arith.subf %44, %45 : vector<32x32xf32>
    %47 = arith.select %41, %39, %46 : vector<32x32xi1>, vector<32x32xf32>
    %c0_22 = arith.constant 0 : index
    %c0_23 = arith.constant 0 : index
    %48 = vector.load %arg5[%c0_22, %c0_23] : memref<32x32xf32, #tpu.memory_space<vmem>>, vector<32x32xf32>
    %c0_24 = arith.constant 0 : index
    %c0_25 = arith.constant 0 : index
    %49 = vector.load %arg6[%c0_24, %c0_25] : memref<32x32xf32, #tpu.memory_space<vmem>>, vector<32x32xf32>
    %c0_26 = arith.constant 0 : index
    %c0_27 = arith.constant 0 : index
    %50 = vector.load %arg7[%c0_26, %c0_27] : memref<1x32xf32, #tpu.memory_space<vmem>>, vector<1x32xf32>
    %c0_28 = arith.constant 0 : index
    %c0_29 = arith.constant 0 : index
    %51 = vector.load %arg8[%c0_28, %c0_29] : memref<1x32xf32, #tpu.memory_space<vmem>>, vector<1x32xf32>
    %c0_30 = arith.constant 0 : index
    %c0_31 = arith.constant 0 : index
    %52 = vector.load %arg9[%c0_30, %c0_31] : memref<32x32xf32, #tpu.memory_space<vmem>>, vector<32x32xf32>
    %cst_32 = arith.constant dense<0.000000e+00> : vector<32x32xf32>
    %53 = tpu.matmul %48, %49, %cst_32 {dimension_numbers = #tpu.dot_dimension_numbers<[1], [0], [0], [1], [0, 0, 1, 1], [], []>} : vector<32x32xf32>, vector<32x32xf32>, vector<32x32xf32> -> vector<32x32xf32>
    %54 = vector.broadcast %50 : vector<1x32xf32> to vector<32x32xf32>
    %55 = arith.mulf %53, %54 : vector<32x32xf32>
    %cst_33 = arith.constant dense<0.000000e+00> : vector<32xf32>
    %56 = vector.multi_reduction <add>, %55, %cst_33 [1] : vector<32x32xf32> to vector<32xf32>
    %57 = vector.shape_cast %56 : vector<32xf32> to vector<32x1xf32>
    %58 = vector.broadcast %51 : vector<1x32xf32> to vector<32x32xf32>
    %59 = arith.mulf %53, %58 : vector<32x32xf32>
    %cst_34 = arith.constant dense<0.000000e+00> : vector<32xf32>
    %60 = vector.multi_reduction <add>, %59, %cst_34 [1] : vector<32x32xf32> to vector<32xf32>
    %61 = vector.shape_cast %60 : vector<32xf32> to vector<32x1xf32>
    %62 = tpu.transpose %61, [1, 0] : vector<32x1xf32> -> vector<1x32xf32>
    %63 = vector.broadcast %57 : vector<32x1xf32> to vector<32x32xf32>
    %64 = vector.broadcast %62 : vector<1x32xf32> to vector<32x32xf32>
    %65 = arith.addf %63, %64 : vector<32x32xf32>
    %cst_35 = arith.constant 0.000000e+00 : f32
    %66 = vector.broadcast %cst_35 : f32 to vector<32x32xf32>
    %67 = arith.cmpf ogt, %65, %66 : vector<32x32xf32>
    %cst_36 = arith.constant 2.000000e-01 : f32
    %68 = vector.broadcast %cst_36 : f32 to vector<32x32xf32>
    %69 = arith.mulf %68, %65 : vector<32x32xf32>
    %70 = arith.select %67, %65, %69 : vector<32x32xi1>, vector<32x32xf32>
    %cst_37 = arith.constant 0.000000e+00 : f32
    %71 = vector.broadcast %cst_37 : f32 to vector<32x32xf32>
    %72 = arith.cmpf ogt, %52, %71 : vector<32x32xf32>
    %cst_38 = arith.constant -1.000000e+09 : f32
    %73 = vector.broadcast %cst_38 : f32 to vector<32x32xf32>
    %74 = arith.select %72, %70, %73 : vector<32x32xi1>, vector<32x32xf32>
    %cst_39 = arith.constant dense<0xFF800000> : vector<32xf32>
    %75 = vector.multi_reduction <maximumf>, %74, %cst_39 [1] : vector<32x32xf32> to vector<32xf32>
    %76 = vector.shape_cast %75 : vector<32xf32> to vector<32x1xf32>
    %77 = vector.broadcast %76 : vector<32x1xf32> to vector<32x32xf32>
    %78 = arith.subf %74, %77 : vector<32x32xf32>
    %79 = math.exp %78 : vector<32x32xf32>
    %cst_40 = arith.constant dense<0.000000e+00> : vector<32xf32>
    %80 = vector.multi_reduction <add>, %79, %cst_40 [1] : vector<32x32xf32> to vector<32xf32>
    %81 = vector.shape_cast %80 : vector<32xf32> to vector<32x1xf32>
    %cst_41 = arith.constant 9.99999968E-21 : f32
    %82 = vector.broadcast %cst_41 : f32 to vector<32x1xf32>
    %83 = arith.maximumf %81, %82 : vector<32x1xf32>
    %84 = tpu.reciprocal %83 {approx = true} : vector<32x1xf32> -> vector<32x1xf32>
    %85 = vector.broadcast %84 : vector<32x1xf32> to vector<32x32xf32>
    %86 = arith.mulf %79, %85 : vector<32x32xf32>
    %cst_42 = arith.constant dense<0.000000e+00> : vector<32x32xf32>
    %87 = tpu.matmul %86, %53, %cst_42 {dimension_numbers = #tpu.dot_dimension_numbers<[1], [0], [0], [1], [0, 0, 1, 1], [], []>} : vector<32x32xf32>, vector<32x32xf32>, vector<32x32xf32> -> vector<32x32xf32>
    %cst_43 = arith.constant 0.000000e+00 : f32
    %88 = vector.broadcast %cst_43 : f32 to vector<32x32xf32>
    %89 = arith.cmpf ogt, %87, %88 : vector<32x32xf32>
    %cst_44 = arith.constant 0.000000e+00 : f32
    %90 = vector.broadcast %cst_44 : f32 to vector<32x32xf32>
    %91 = arith.minimumf %87, %90 : vector<32x32xf32>
    %92 = math.exp %91 : vector<32x32xf32>
    %cst_45 = arith.constant 1.000000e+00 : f32
    %93 = vector.broadcast %cst_45 : f32 to vector<32x32xf32>
    %94 = arith.subf %92, %93 : vector<32x32xf32>
    %95 = arith.select %89, %87, %94 : vector<32x32xi1>, vector<32x32xf32>
    %96 = tpu.iota {dimensions = array<i32: 1>} : vector<8x32xi32>
    %97 = tpu.iota {dimensions = array<i32: 1>} : vector<8x32xi32>
    %c0_46 = arith.constant 0 : index
    %c0_47 = arith.constant 0 : index
    %98 = vector.load %arg10[%c0_46, %c0_47] : memref<8x1xi32, #tpu.memory_space<vmem>>, vector<8x1xi32>
    %99 = vector.broadcast %98 : vector<8x1xi32> to vector<8x32xi32>
    %100 = arith.cmpi eq, %96, %99 : vector<8x32xi32>
    %101 = arith.extui %100 : vector<8x32xi1> to vector<8x32xi32>
    %102 = arith.sitofp %101 : vector<8x32xi32> to vector<8x32xf32>
    %c0_48 = arith.constant 0 : index
    %c0_49 = arith.constant 0 : index
    %103 = vector.load %arg11[%c0_48, %c0_49] : memref<8x1xi32, #tpu.memory_space<vmem>>, vector<8x1xi32>
    %104 = vector.broadcast %103 : vector<8x1xi32> to vector<8x32xi32>
    %105 = arith.cmpi eq, %97, %104 : vector<8x32xi32>
    %106 = arith.extui %105 : vector<8x32xi1> to vector<8x32xi32>
    %107 = arith.sitofp %106 : vector<8x32xi32> to vector<8x32xf32>
    %cst_50 = arith.constant dense<0.000000e+00> : vector<8x32xf32>
    %108 = tpu.matmul %102, %47, %cst_50 {dimension_numbers = #tpu.dot_dimension_numbers<[1], [0], [0], [1], [0, 0, 1, 1], [], []>} : vector<8x32xf32>, vector<32x32xf32>, vector<8x32xf32> -> vector<8x32xf32>
    %cst_51 = arith.constant dense<0.000000e+00> : vector<8x32xf32>
    %109 = tpu.matmul %107, %95, %cst_51 {dimension_numbers = #tpu.dot_dimension_numbers<[1], [0], [0], [1], [0, 0, 1, 1], [], []>} : vector<8x32xf32>, vector<32x32xf32>, vector<8x32xf32> -> vector<8x32xf32>
    %110 = tpu.concatenate %108, %109 in 1 : vector<8x32xf32>, vector<8x32xf32> -> vector<8x64xf32>
    %c0_52 = arith.constant 0 : index
    %c0_53 = arith.constant 0 : index
    %111 = vector.load %arg16[%c0_52, %c0_53] : memref<8x64xf32, #tpu.memory_space<vmem>>, vector<8x64xf32>
    tpu.vector_store %arg16[%c0_52, %c0_53], %110 {strides = array<i32>} : memref<8x64xf32, #tpu.memory_space<vmem>>, vector<8x64xf32>,
    %c0_54 = arith.constant 0 : index
    %c0_55 = arith.constant 0 : index
    %112 = vector.load %arg12[%c0_54, %c0_55] : memref<64x32xf32, #tpu.memory_space<vmem>>, vector<64x32xf32>
    %cst_56 = arith.constant dense<0.000000e+00> : vector<8x32xf32>
    %113 = tpu.matmul %110, %112, %cst_56 {dimension_numbers = #tpu.dot_dimension_numbers<[1], [0], [0], [1], [0, 0, 1, 1], [], []>} : vector<8x64xf32>, vector<64x32xf32>, vector<8x32xf32> -> vector<8x32xf32>
    %c0_57 = arith.constant 0 : index
    %c0_58 = arith.constant 0 : index
    %114 = vector.load %arg13[%c0_57, %c0_58] : memref<1x32xf32, #tpu.memory_space<vmem>>, vector<1x32xf32>
    %115 = vector.broadcast %114 : vector<1x32xf32> to vector<8x32xf32>
    %116 = arith.addf %113, %115 : vector<8x32xf32>
    %cst_59 = arith.constant 0.000000e+00 : f32
    %117 = vector.broadcast %cst_59 : f32 to vector<8x32xf32>
    %118 = arith.maximumf %116, %117 : vector<8x32xf32>
    %c0_60 = arith.constant 0 : index
    %c0_61 = arith.constant 0 : index
    %119 = vector.load %arg14[%c0_60, %c0_61] : memref<1x32xf32, #tpu.memory_space<vmem>>, vector<1x32xf32>
    %120 = vector.broadcast %119 : vector<1x32xf32> to vector<8x32xf32>
    %121 = arith.mulf %118, %120 : vector<8x32xf32>
    %cst_62 = arith.constant dense<0.000000e+00> : vector<8xf32>
    %122 = vector.multi_reduction <add>, %121, %cst_62 [1] : vector<8x32xf32> to vector<8xf32>
    %123 = vector.shape_cast %122 : vector<8xf32> to vector<8x1xf32>
    %c0_63 = arith.constant 0 : index
    %c0_64 = arith.constant 0 : index
    %124 = vector.load %arg15[%c0_63, %c0_64] : memref<1x1xf32, #tpu.memory_space<vmem>>, vector<1x1xf32>
    %125 = vector.broadcast %124 : vector<1x1xf32> to vector<8x1xf32>
    %126 = arith.addf %123, %125 : vector<8x1xf32>
    %127 = tpu.transpose %126, [1, 0] : vector<8x1xf32> -> vector<1x8xf32>
    %c0_65 = arith.constant 0 : index
    %c0_66 = arith.constant 0 : index
    %128 = vector.load %arg17[%c0_65, %c0_66] : memref<1x8xf32, #tpu.memory_space<vmem>>, vector<1x8xf32>
    tpu.vector_store %arg17[%c0_65, %c0_66], %127 {strides = array<i32>} : memref<1x8xf32, #tpu.memory_space<vmem>>, vector<1x8xf32>,
    return
  }
}

</mosaic_0001>

<bundles_post_ra>
// kernel: gatcf_forward.1
= control target key start
LH: loop header
LB: loop body
LE: loop exit
PB: predicated region body
PF: predicated region fallthrough
CT: control target
= control target key end

     0   :  { %s1978_s0 = inlined_call_operand.vmem [shape: f32[32,32], index: 0, kind: input, shape index: {}]   ;;  %s1979_s1 = inlined_call_operand.vmem [shape: f32[32,32], index: 1, kind: input, shape index: {}]   ;;  %s1980_s2 = inlined_call_operand.vmem [shape: f32[1,32], index: 2, kind: input, shape index: {}]   ;;  %s1981_s3 = inlined_call_operand.vmem [shape: f32[1,32], index: 3, kind: input, shape index: {}]   ;;  %s1982_s4 = inlined_call_operand.vmem [shape: f32[32,32], index: 4, kind: input, shape index: {}]   ;;  %s1983_s5 = inlined_call_operand.hbm [shape: f32[32,32], index: 5, kind: input, shape index: {}]   ;;  %s1984_s6 = inlined_call_operand.hbm [shape: f32[32,32], index: 6, kind: input, shape index: {}]   ;;  %s1985_s7 = inlined_call_operand.vmem [shape: f32[1,32], index: 7, kind: input, shape index: {}]   ;;  %s1986_s8 = inlined_call_operand.vmem [shape: f32[1,32], index: 8, kind: input, shape index: {}]   ;;  %s1987_s9 = inlined_call_operand.hbm [shape: f32[32,32], index: 9, kind: input, shape index: {}]   ;;  %s1988_s10 = inlined_call_operand.vmem [shape: s32[8,1], index: 10, kind: input, shape index: {}]   ;;  %s1989_s11 = inlined_call_operand.vmem [shape: s32[8,1], index: 11, kind: input, shape index: {}]   ;;  %s1990_s12 = inlined_call_operand.vmem [shape: f32[64,32], index: 12, kind: input, shape index: {}]   ;;  %s1991_s13 = inlined_call_operand.vmem [shape: f32[1,32], index: 13, kind: input, shape index: {}]   ;;  %s1992_s14 = inlined_call_operand.vmem [shape: f32[1,32], index: 14, kind: input, shape index: {}]   ;;  %s1993_s15 = inlined_call_operand.<no memory space> [shape: f32[1,1], index: 15, kind: input, shape index: {}]   ;;  %s1994_s16 = inlined_call_operand.hbm [shape: f32[8,64], index: 16, kind: output, shape index: {0}]   ;;  %s1995_s17 = inlined_call_operand.hbm [shape: f32[1,8], index: 17, kind: output, shape index: {1}]  }
   0x1   :  { %1998 = sst [smem:[#allocation16_spill]] %s1978_s0  ;;  %v23_v0 = vstv %s1993_s15 }
   0x2   :  { %1999 = sst [smem:[#allocation17_spill]] %s1979_s1  ;;  %24 = vst [vmem:[#allocation2] sm:$0x1] %v23_v0 }
   0x3   :  { %25 = vsyncpa [#allocation4], 0 }
   0x4   :  { %26 = vsyncpa [#allocation7], 0 }
   0x5   :  { %27 = vsyncpa [#allocation5], 0 }
   0x6   :  { %28 = vsyncpa [#allocation11], 0  ;;  %s1630_s26 = smov [#allocation6]   ;;  %s1631_s28 = smov [#allocation3]  }
   0x7   :  { %s56_s27 = sshll.u32 %s1630_s26, 4  ;;  %s44_s29 = sshll.u32 %s1631_s28, 4  ;;  %s57_s27 = int_to_ptr.vmem [resolvable:$true] %s56_s27  ;;  %s1735_s29 = int_to_ptr.vmem [resolvable:$true] %s44_s29 }
   0x8   :  { %s1512_s18 = scalar_lea.hbm %s1984_s6, 512 }
   0x9   :  { %p1513_p0 = scmp.ne.s32.totalorder %s1984_s6, %s1512_s18  ;;  %p1516_p1 = scmp.lt.u32.totalorder %s1512_s18, %s1984_s6 }
   0xb   :  { %p1518_p2 = pnand %p1516_p1, %p1513_p0 }
   0xd   :  { %1521 = shalt.err (!%p1518_p2)
}
   0xe   :  { %s1522_s21 = scalar_lea.vmem %s57_s27, 512  ;;  %p1527_p4 = scmp.lt.s32.totalorder %s57_s27, %s57_s27 }
   0xf   :  { %p1523_p3 = scmp.ne.s32.totalorder %s57_s27, %s1522_s21  ;;  %p1528_p5 = scmp.lt.s32.totalorder %s1522_s21, %s1522_s21 }
  0x11   :  { %p1529_p6 = por %p1528_p5, %p1527_p4 }
  0x13   :  { %p1530_p7 = pnand %p1529_p6, %p1523_p3 }
  0x15   :  { %1533 = shalt.err (!%p1530_p7)
}
  0x16   :  { %s1632_s22 = smov 128   ;;  %s1633_s23 = smov 8  }
  0x17   :  { %62 = dma.hbm_to_vmem [thread:$0]  %s1984_s6, 512, %s57_s27, [#allocation7], %s1632_s22, %s1632_s22, %s1633_s23  }
  0x18   :  { %s1534_s0 = scalar_lea.hbm %s1983_s5, 512 }
  0x19   :  { %p1535_p8 = scmp.ne.s32.totalorder %s1983_s5, %s1534_s0  ;;  %p1538_p9 = scmp.lt.u32.totalorder %s1534_s0, %s1983_s5 }
  0x1b   :  { %p1540_p10 = pnand %p1538_p9, %p1535_p8 }
  0x1d   :  { %1543 = shalt.err (!%p1540_p10)
}
  0x1e   :  { %s1544_s15 = scalar_lea.vmem %s1735_s29, 512  ;;  %p1549_p12 = scmp.lt.s32.totalorder %s1735_s29, %s1735_s29 }
  0x1f   :  { %p1545_p11 = scmp.ne.s32.totalorder %s1735_s29, %s1544_s15  ;;  %p1550_p13 = scmp.lt.s32.totalorder %s1544_s15, %s1544_s15 }
  0x21   :  { %p1551_p0 = por %p1550_p13, %p1549_p12 }
  0x23   :  { %p1552_p1 = pnand %p1551_p0, %p1545_p11 }
  0x25   :  { %1555 = shalt.err (!%p1552_p1)
}
  0x26   :  { %50 = dma.hbm_to_vmem [thread:$0]  %s1983_s5, 512, %s1735_s29, [#allocation4], %s1632_s22, %s1632_s22, %s1633_s23  }
  0x27   :  { %s1634_s20 = smov [#allocation8]   ;;  %s1556_s26 = scalar_lea.hbm %s1987_s9, 512 }
  0x28   :  { %s72_s21 = sshll.u32 %s1634_s20, 4  ;;  %p1557_p2 = scmp.ne.s32.totalorder %s1987_s9, %s1556_s26  ;;  %s73_s21 = int_to_ptr.vmem [resolvable:$true] %s72_s21 }
  0x29   :  { %p1560_p3 = scmp.lt.u32.totalorder %s1556_s26, %s1987_s9 }
  0x2b   :  { %p1562_p4 = pnand %p1560_p3, %p1557_p2 }
  0x2d   :  { %1565 = shalt.err (!%p1562_p4)
}
  0x2e   :  { %s1566_s19 = scalar_lea.vmem %s73_s21, 512  ;;  %p1571_p6 = scmp.lt.s32.totalorder %s73_s21, %s73_s21 }
  0x2f   :  { %p1567_p5 = scmp.ne.s32.totalorder %s73_s21, %s1566_s19  ;;  %p1572_p7 = scmp.lt.s32.totalorder %s1566_s19, %s1566_s19 }
  0x31   :  { %p1573_p8 = por %p1572_p7, %p1571_p6 }
  0x33   :  { %p1574_p9 = pnand %p1573_p8, %p1567_p5 }
  0x35   :  { %1577 = shalt.err (!%p1574_p9)
}
  0x36   :  { %78 = dma.hbm_to_vmem [thread:$0]  %s1987_s9, 512, %s73_s21, [#allocation7], %s1632_s22, %s1632_s22, %s1633_s23  }
  0x37   :  { %1622 = dma.done.wait [#allocation4], 512  }
  0x38   :  { %1623 = vsyncadd [#allocation4], 4294966784 }
  0x39   :  { %1624 = dma.done.wait [#allocation7], 1024  }
  0x3a   :  { %1625 = vsyncadd [#allocation7], 4294966272  ;;  %s2000_s6 = sld [smem:[#allocation17_spill]]  ;;  %v489_v3 = vld [vmem:[#allocation6] sm:$0xff]  ;;  %vm114_vm0 = vcmask 261120   ;;  %v490_v5 = vld [vmem:[#allocation6 + $0x8] sm:$0xff] }
  0x3b   :  { %v1410_v8 = vpack.c.bf16 %v490_v5, %v489_v3  ;;  %v491_v10 = vld [vmem:[#allocation6 + $0x10] sm:$0xff]  ;;  %v492_v11 = vld [vmem:[#allocation6 + $0x18] sm:$0xff]  ;;  %s2001_s26 = sld [smem:[#allocation16_spill]]  ;;  %v485_v14 = vld [vmem:[#allocation3] sm:$0xff]  ;;  %s1639_s24 = smov 32  }
  0x3c   :  { %v1414_v13 = vpack.c.bf16 %v492_v11, %v491_v10  ;;  %1333 = vmatprep.mubr.msk.f32.mxu0 %vm114_vm0, %v485_v14  ;;  %v486_v16 = vld [vmem:[#allocation3 + $0x8] sm:$0xff]  ;;  %v487_v18 = vld [vmem:[#allocation3 + $0x10] sm:$0xff]  ;;  %v488_v20 = vld [vmem:[#allocation3 + $0x18] sm:$0xff]  ;;  %s1640_s23 = smov [#allocation9]  }
  0x3d   :  { %1411 = vmatprep.subr.bf16.mxu0 %v1410_v8  ;;  %v1215_v21 = vld [vmem:[%s1981_s3] ss:$0 sm:$0xff]  ;;  %s1186_s21 = sshll.u32 %s1640_s23, 4  ;;  %s1187_s21 = int_to_ptr.vmem [resolvable:$true] %s1186_s21 }
  0x3e   :  { %1413 = vmatpush3.bf16.msra.mxu0 %v1410_v8  ;;  %v1229_v22 = vld [vmem:[%s1986_s8] ss:$0 sm:$0xff]  ;;  %p1583_p11 = scmp.lt.s32.totalorder %s1187_s21, %s1187_s21 }
  0x3f   :  { %1415 = vmatprep.subr.bf16.mxu0 %v1414_v13  ;;  %v1214_v45 = vld [vmem:[%s1980_s2] ss:$0 sm:$0xff] }
  0x40   :  { %v104_v1 = vld [vmem:[%s2000_s6] sm:$0xff]  ;;  %v105_v2 = vld [vmem:[%s2000_s6 + $0x8] sm:$0xff]  ;;  %v106_v6 = vld [vmem:[%s2000_s6 + $0x10] sm:$0xff] }
  0x41   :  { %v1394_v4 = vpack.c.bf16 %v105_v2, %v104_v1  ;;  %v107_v7 = vld [vmem:[%s2000_s6 + $0x18] sm:$0xff]  ;;  %v100_v12 = vld [vmem:[%s2001_s26] sm:$0xff]  ;;  %v101_v15 = vld [vmem:[%s2001_s26 + $0x8] sm:$0xff] }
  0x42   :  { %v1398_v9 = vpack.c.bf16 %v107_v7, %v106_v6  ;;  %1305 = vmatprep.mubr.msk.f32.mxu1 %vm114_vm0, %v100_v12  ;;  %1417 = vmatpush3.bf16.msra.mxu0 %v1414_v13  ;;  %v102_v17 = vld [vmem:[%s2001_s26 + $0x10] sm:$0xff]  ;;  %v103_v19 = vld [vmem:[%s2001_s26 + $0x18] sm:$0xff]  ;;  %v1228_v50 = vld [vmem:[%s1985_s7] ss:$0 sm:$0xff] }
  0x43   :  { %1395 = vmatprep.subr.bf16.mxu1 %v1394_v4 }
  0x44   :  { %1397 = vmatpush3.bf16.msra.mxu1 %v1394_v4 }
  0x45   :  { %1399 = vmatprep.subr.bf16.mxu1 %v1398_v9  ;;  %1334 = vmatmul.mubr.msk.f32.vlgmr.msra.gmra.mrb[0].mxu0 %vm114_vm0, %v486_v16  ;;  %v288_v16 = vlaneseq }
  0x46   :  { %1336 = vmatprep.mubr.msk.f32.mxu0 %vm114_vm0, %v487_v18 }
  0x48   :  { %1401 = vmatpush3.bf16.msra.mxu1 %v1398_v9 }
  0x49   :  { %1337 = vmatmul.mubr.msk.f32.gmra.mrb[2].mxu0 %vm114_vm0, %v488_v20 }
  0x4b   :  { %1306 = vmatmul.mubr.msk.f32.vlgmr.msra.gmra.mrb[0].mxu1 %vm114_vm0, %v101_v15 }
  0x4c   :  { %1308 = vmatprep.mubr.msk.f32.mxu1 %vm114_vm0, %v102_v17 }
  0x4f   :  { %1309 = vmatmul.mubr.msk.f32.gmra.mrb[2].mxu1 %vm114_vm0, %v103_v19  ;;  %v289_v19 = vshrl.u32 %v288_v16, 7 }
 0x118   :  { %v1335_v24 = vpop.f32.mrb[0].mxu0 }
 0x119   :  { %v625_v28 = vmul.f32 %v1335_v24, %v1229_v22  ;;  %v577_v29 = vpop.f32.mrb[1].mxu0  ;;  %v603_v62 = vmul.f32 %v1335_v24, %v1228_v50 }
 0x11a   :  { %v1825_v30 = vpack.c.bf16 %v1335_v24, %v577_v29  ;;  %v624_v43 = vmul.f32 %v1229_v22, %v577_v29  ;;  %v602_v53 = vmul.f32 %v1228_v50, %v577_v29 }
 0x11b   :  { %v631_v33 = vsel %vm114_vm0, %v625_v28, 0.0  ;;  %v609_v1 = vsel %vm114_vm0, %v603_v62, 0.0 }
 0x11c   :  { %632 = vadd.xlane.f32.xlu1 %v631_v33  ;;  %v1338_v37 = vpop.f32.mrb[2].mxu0  ;;  %v628_v48 = vsel %vm114_vm0, %v624_v43, 0.0  ;;  %v606_v56 = vsel %vm114_vm0, %v602_v53, 0.0 }
 0x11d   :  { %v587_v40 = vpop.f32.mrb[3].mxu0  ;;  %v627_v47 = vmul.f32 %v1338_v37, %v1229_v22  ;;  %v605_v2 = vmul.f32 %v1338_v37, %v1228_v50 }
 0x11e   :  { %v1307_v23 = vpop.f32.mrb[0].mxu1  ;;  %v1831_v44 = vpack.c.bf16 %v1338_v37, %v587_v40  ;;  %v626_v55 = vmul.f32 %v1229_v22, %v587_v40  ;;  %v604_v0 = vmul.f32 %v1228_v50, %v587_v40 }
 0x11f   :  { %v193_v25 = vpop.f32.mrb[1].mxu1  ;;  %v241_v26 = vmul.f32 %v1307_v23, %v1215_v21  ;;  %v637_v51 = vsel %vm114_vm0, %v627_v47, 0.0  ;;  %v219_v54 = vmul.f32 %v1307_v23, %v1214_v45  ;;  %v615_v4 = vsel %vm114_vm0, %v605_v2, 0.0  ;;  %v496_v47 = vld [vmem:[#allocation8 + $0x8] sm:$0xff] }
 0x120   :  { %v1402_v27 = vpack.c.bf16 %v1307_v23, %v193_v25  ;;  %v240_v32 = vmul.f32 %v1215_v21, %v193_v25  ;;  %v218_v49 = vmul.f32 %v1214_v45, %v193_v25  ;;  %v634_v59 = vsel %vm114_vm0, %v626_v55, 0.0  ;;  %v111_v25 = vld [vmem:[%s1982_s4 + $0x8] sm:$0xff] }
 0x121   :  { %v247_v31 = vsel %vm114_vm0, %v241_v26, 0.0  ;;  %v225_v57 = vsel %vm114_vm0, %v219_v54, 0.0  ;;  %v612_v3 = vsel %vm114_vm0, %v604_v0, 0.0  ;;  %v110_v26 = vld [vmem:[%s1982_s4] sm:$0xff]  ;;  %vm309_vm1 = vcmp.gt.f32.partialorder %v111_v25, 0.0 }
 0x122   :  { %248 = vadd.xlane.f32.xlu0 %v247_v31  ;;  %v1310_v34 = vpop.f32.mrb[2].mxu1  ;;  %1403 = vmatprep.subr.bf16.mxu1 %v1402_v27  ;;  %v244_v41 = vsel %vm114_vm0, %v240_v32, 0.0  ;;  %v222_v52 = vsel %vm114_vm0, %v218_v49, 0.0  ;;  %vm308_vm2 = vcmp.gt.f32.partialorder %v110_v26, 0.0  ;;  %vm693_vm9 = vcmp.gt.f32.partialorder %v496_v47, 0.0 }
 0x123   :  { %v203_v35 = vpop.f32.mrb[3].mxu1  ;;  %1405 = vmatpush3.bf16.msra.mxu1 %v1402_v27  ;;  %v243_v36 = vmul.f32 %v1310_v34, %v1215_v21  ;;  %v221_v58 = vmul.f32 %v1310_v34, %v1214_v45  ;;  %v113_v27 = vld [vmem:[%s1982_s4 + $0x18] sm:$0xff] }
 0x124   :  { %v1406_v38 = vpack.c.bf16 %v1310_v34, %v203_v35  ;;  %v242_v39 = vmul.f32 %v1215_v21, %v203_v35  ;;  %v220_v60 = vmul.f32 %v1214_v45, %v203_v35  ;;  %v290_v21 = vsub.s32 0, %v289_v19  ;;  %v112_v34 = vld [vmem:[%s1982_s4 + $0x10] sm:$0xff] }
 0x125   :  { %v253_v42 = vsel %vm114_vm0, %v243_v36, 0.0  ;;  %v231_v61 = vsel %vm114_vm0, %v221_v58, 0.0  ;;  %vm311_vm3 = vcmp.gt.f32.partialorder %v113_v27, 0.0  ;;  %vm310_vm8 = vcmp.gt.f32.partialorder %v112_v34, 0.0 }
 0x126   :  { %245 = vadd.xlane.f32.xlu0 %v244_v41  ;;  %1407 = vmatprep.subr.bf16.mxu1 %v1406_v38  ;;  %v250_v46 = vsel %vm114_vm0, %v242_v39, 0.0  ;;  %v228_v63 = vsel %vm114_vm0, %v220_v60, 0.0  ;;  %v497_v60 = vld [vmem:[#allocation8 + $0x10] sm:$0xff] }
 0x127   :  { %254 = vadd.xlane.f32.xlu1 %v253_v42  ;;  %1409 = vmatpush3.bf16.msra.mxu1 %v1406_v38 }
 0x128   :  { %1419 = vmatprep.subr.bf16.mxu1 %v1825_v30 }
 0x12a   :  { %629 = vadd.xlane.f32.xlu0 %v628_v48 }
 0x12b   :  { %251 = vadd.xlane.f32.xlu1 %v250_v46 }
 0x12e   :  { %223 = vadd.xlane.f32.xlu0 %v222_v52  ;;  %v495_v52 = vld [vmem:[#allocation8] sm:$0xff] }
 0x12f   :  { %638 = vadd.xlane.f32.xlu1 %v637_v51  ;;  %vm692_vm10 = vcmp.gt.f32.partialorder %v495_v52, 0.0 }
 0x132   :  { %607 = vadd.xlane.f32.xlu0 %v606_v56 }
 0x133   :  { %226 = vadd.xlane.f32.xlu1 %v225_v57 }
 0x136   :  { %635 = vadd.xlane.f32.xlu0 %v634_v59  ;;  %v498_v59 = vld [vmem:[#allocation8 + $0x18] sm:$0xff] }
 0x137   :  { %232 = vadd.xlane.f32.xlu1 %v231_v61  ;;  %vm695_vm15 = vcmp.gt.f32.partialorder %v498_v59, 0.0 }
 0x13a   :  { %229 = vadd.xlane.f32.xlu0 %v228_v63 }
 0x13b   :  { %610 = vadd.xlane.f32.xlu1 %v609_v1 }
 0x13e   :  { %613 = vadd.xlane.f32.xlu0 %v612_v3 }
 0x13f   :  { %616 = vadd.xlane.f32.xlu1 %v615_v4 }
 0x1a9   :  { %v633_v6 = vpop.xlane.xlu1 %632 }
 0x1af   :  { %v249_v5 = vpop.xlane.xlu0 %248 }
 0x1b3   :  { %v246_v7 = vpop.xlane.xlu0 %245 }
 0x1b4   :  { %256 = vxpose.xlu0.b32.start [1/4] (short) (narrow) %v246_v7, 8  ;;  %v255_v8 = vpop.xlane.xlu1 %254 }
 0x1b7   :  { %v630_v9 = vpop.xlane.xlu0 %629 }
 0x1b8   :  { %640 = vxpose.xlu1.b32.start [1/4] (short) (narrow) %v630_v9, 8  ;;  %257 = vxpose.xlu0.b32.cont [2/4] (short) (narrow) %v249_v5, 8  ;;  %v252_v10 = vpop.xlane.xlu1 %251 }
 0x1bb   :  { %v224_v11 = vpop.xlane.xlu0 %223 }
 0x1bc   :  { %641 = vxpose.xlu1.b32.cont [2/4] (short) (narrow) %v633_v6, 8  ;;  %258 = vxpose.xlu0.b32.cont [3/4] (short) (narrow) %v252_v10, 8  ;;  %v639_v14 = vpop.xlane.xlu1 %638 }
 0x1bf   :  { %v608_v12 = vpop.xlane.xlu0 %607 }
 0x1c0   :  { %259 = vxpose.xlu0.b32.end [4/4] (short) (narrow) %v255_v8, 8  ;;  %v227_v15 = vpop.xlane.xlu1 %226 }
 0x1c3   :  { %v636_v13 = vpop.xlane.xlu0 %635 }
 0x1c4   :  { %642 = vxpose.xlu1.b32.cont [3/4] (short) (narrow) %v636_v13, 8  ;;  %v233_v18 = vpop.xlane.xlu1 %232 }
 0x1c7   :  { %v230_v17 = vpop.xlane.xlu0 %229 }
 0x1c8   :  { %643 = vxpose.xlu1.b32.end [4/4] (short) (narrow) %v639_v14, 8  ;;  %v611_v22 = vpop.xlane.xlu1 %610 }
 0x1cb   :  { %v614_v20 = vpop.xlane.xlu0 %613 }
 0x1cc   :  { %v617_v33 = vpop.xlane.xlu1 %616 }
 0x234   :  { %v272_v23 = vpop.trf.xlu0 }
 0x235   :  { %v291_v24 = vrot.slane %v272_v23, %v290_v21 }
 0x237   :  { %v293_v28 = vadd.f32 %v291_v24, %v227_v15  ;;  %v292_v29 = vadd.f32 %v291_v24, %v224_v11  ;;  %v295_v31 = vadd.f32 %v291_v24, %v233_v18  ;;  %v294_v32 = vadd.f32 %v291_v24, %v230_v17 }
 0x239   :  { %vm297_vm4 = vcmp.gt.f32.partialorder %v293_v28, 0.0  ;;  %v301_v35 = vmul.f32 0.2, %v293_v28  ;;  %vm296_vm5 = vcmp.gt.f32.partialorder %v292_v29, 0.0  ;;  %v300_v36 = vmul.f32 0.2, %v292_v29 }
 0x23a   :  { %vm299_vm6 = vcmp.gt.f32.partialorder %v295_v31, 0.0  ;;  %v303_v37 = vmul.f32 0.2, %v295_v31  ;;  %vm298_vm7 = vcmp.gt.f32.partialorder %v294_v32, 0.0  ;;  %v302_v38 = vmul.f32 0.2, %v294_v32 }
 0x23b   :  { %v305_v39 = vsel %vm297_vm4, %v293_v28, %v301_v35  ;;  %v304_v40 = vsel %vm296_vm5, %v292_v29, %v300_v36 }
 0x23c   :  { %v656_v41 = vpop.trf.xlu1  ;;  %v313_v42 = vsel %vm309_vm1, %v305_v39, -1e+09  ;;  %v312_v43 = vsel %vm308_vm2, %v304_v40, -1e+09  ;;  %v307_v45 = vsel %vm299_vm6, %v295_v31, %v303_v37  ;;  %v306_v46 = vsel %vm298_vm7, %v294_v32, %v302_v38 }
 0x23d   :  { %v675_v48 = vrot.slane %v656_v41, %v290_v21  ;;  %v319_v49 = vsel %vm114_vm0, %v313_v42, -inf  ;;  %v316_v50 = vsel %vm114_vm0, %v312_v43, -inf  ;;  %v315_v51 = vsel %vm311_vm3, %v307_v45, -1e+09 }
 0x23e   :  { %320 = vmax.xlane.f32.xlu1 %v319_v49  ;;  %317 = vmax.xlane.f32.xlu0 %v316_v50  ;;  %v314_v53 = vsel %vm310_vm8, %v306_v46, -1e+09  ;;  %v325_v57 = vsel %vm114_vm0, %v315_v51, -inf  ;;  %vm694_vm1 = vcmp.gt.f32.partialorder %v497_v60, 0.0  ;;  %vm1637_vm2 = vmmov 0  }
 0x23f   :  { %v677_v54 = vadd.f32 %v675_v48, %v611_v22  ;;  %v676_v55 = vadd.f32 %v675_v48, %v608_v12  ;;  %v679_v56 = vadd.f32 %v675_v48, %v617_v33  ;;  %v322_v58 = vsel %vm114_vm0, %v314_v53, -inf }
 0x240   :  { %v678_v61 = vadd.f32 %v675_v48, %v614_v20 }
 0x241   :  { %vm681_vm11 = vcmp.gt.f32.partialorder %v677_v54, 0.0  ;;  %v685_v62 = vmul.f32 0.2, %v677_v54  ;;  %vm680_vm12 = vcmp.gt.f32.partialorder %v676_v55, 0.0  ;;  %v684_v63 = vmul.f32 0.2, %v676_v55 }
 0x242   :  { %326 = vmax.xlane.f32.xlu1 %v325_v57  ;;  %323 = vmax.xlane.f32.xlu0 %v322_v58  ;;  %vm683_vm13 = vcmp.gt.f32.partialorder %v679_v56, 0.0  ;;  %v687_v0 = vmul.f32 0.2, %v679_v56  ;;  %vm682_vm14 = vcmp.gt.f32.partialorder %v678_v61, 0.0  ;;  %v686_v1 = vmul.f32 0.2, %v678_v61 }
 0x243   :  { %v689_v2 = vsel %vm681_vm11, %v677_v54, %v685_v62  ;;  %v688_v3 = vsel %vm680_vm12, %v676_v55, %v684_v63  ;;  %v878_v57 = vld [vmem:[%s1989_s11] sm:$0xff]  ;;  %v1635_v58 = vmov 0  }
 0x244   :  { %v697_v4 = vsel %vm693_vm9, %v689_v2, -1e+09  ;;  %v696_v5 = vsel %vm692_vm10, %v688_v3, -1e+09  ;;  %v691_v6 = vsel %vm683_vm13, %v679_v56, %v687_v0  ;;  %v690_v7 = vsel %vm682_vm14, %v678_v61, %v686_v1  ;;  %1462 = vset.pattern.permute.xlu0 %v1635_v58  ;;  %1463 = vset.pattern.permute.xlu1 %v1635_v58 }
 0x245   :  { %v703_v8 = vsel %vm114_vm0, %v697_v4, -inf  ;;  %v700_v9 = vsel %vm114_vm0, %v696_v5, -inf  ;;  %v699_v10 = vsel %vm695_vm15, %v691_v6, -1e+09  ;;  %v698_v11 = vsel %vm694_vm1, %v690_v7, -1e+09 }
 0x246   :  { %704 = vmax.xlane.f32.xlu1 %v703_v8  ;;  %701 = vmax.xlane.f32.xlu0 %v700_v9  ;;  %v709_v12 = vsel %vm114_vm0, %v699_v10, -inf  ;;  %v706_v13 = vsel %vm114_vm0, %v698_v11, -inf  ;;  %vm1036_vm13 = vcmask 523264  }
 0x24a   :  { %710 = vmax.xlane.f32.xlu1 %v709_v12  ;;  %707 = vmax.xlane.f32.xlu0 %v706_v13 }
 0x2cb   :  { %v321_v14 = vpop.xlane.xlu1 %320  ;;  %v318_v15 = vpop.xlane.xlu0 %317 }
 0x2cc   :  { %v329_v17 = vsub.f32 %v313_v42, %v321_v14  ;;  %v328_v18 = vsub.f32 %v312_v43, %v318_v15 }
 0x2ce   :  { %v334_v19 = vmul.f32 1.442695, %v329_v17  ;;  %v332_v20 = vmul.f32 1.442695, %v328_v18 }
 0x2cf   :  { %v327_v21 = vpop.xlane.xlu1 %326  ;;  %v324_v22 = vpop.xlane.xlu0 %323 }
 0x2d0   :  { %1464 = vpow2.f32 %v334_v19  ;;  %v331_v23 = vsub.f32 %v315_v51, %v327_v21  ;;  %v330_v24 = vsub.f32 %v314_v53, %v324_v22 }
 0x2d1   :  { %1466 = vpow2.f32 %v332_v20 }
 0x2d2   :  { %v338_v25 = vmul.f32 1.442695, %v331_v23  ;;  %v336_v26 = vmul.f32 1.442695, %v330_v24 }
 0x2d3   :  { %v705_v27 = vpop.xlane.xlu1 %704  ;;  %v702_v28 = vpop.xlane.xlu0 %701 }
 0x2d4   :  { %1468 = vpow2.f32 %v338_v25  ;;  %v713_v29 = vsub.f32 %v697_v4, %v705_v27  ;;  %v712_v31 = vsub.f32 %v696_v5, %v702_v28  ;;  %v871_v27 = vld [vmem:[%s1988_s10] sm:$0xff]  ;;  %v1636_v28 = vmov 0.0|0.0  }
 0x2d5   :  { %1470 = vpow2.f32 %v336_v26  ;;  %1426 = vmatprep.subr.bf16.mxu0 %v1636_v28 }
 0x2d6   :  { %v718_v32 = vmul.f32 1.442695, %v713_v29  ;;  %v716_v33 = vmul.f32 1.442695, %v712_v31 }
 0x2d7   :  { %v711_v34 = vpop.xlane.xlu1 %710  ;;  %v708_v35 = vpop.xlane.xlu0 %707 }
 0x2d8   :  { %1472 = vpow2.f32 %v718_v32  ;;  %v715_v36 = vsub.f32 %v699_v10, %v711_v34  ;;  %v714_v37 = vsub.f32 %v698_v11, %v708_v35 }
 0x2d9   :  { %1474 = vpow2.f32 %v716_v33 }
 0x2da   :  { %v1465_v38 = vpop.eup %1464  ;;  %v722_v39 = vmul.f32 1.442695, %v715_v36  ;;  %v720_v40 = vmul.f32 1.442695, %v714_v37 }
 0x2db   :  { %v1467_v41 = vpop.eup %1466  ;;  %v343_v42 = vsel %vm114_vm0, %v1465_v38, 0.0 }
 0x2dc   :  { %1476 = vpow2.f32 %v722_v39  ;;  %344 = vadd.xlane.f32.xlu1 %v343_v42  ;;  %v340_v43 = vsel %vm114_vm0, %v1467_v41, 0.0 }
 0x2dd   :  { %1478 = vpow2.f32 %v720_v40  ;;  %341 = vadd.xlane.f32.xlu0 %v340_v43 }
 0x2de   :  { %v1469_v45 = vpop.eup %1468 }
 0x2df   :  { %v1471_v46 = vpop.eup %1470  ;;  %v349_v47 = vsel %vm114_vm0, %v1469_v45, 0.0 }
 0x2e0   :  { %350 = vadd.xlane.f32.xlu1 %v349_v47  ;;  %v346_v48 = vsel %vm114_vm0, %v1471_v46, 0.0 }
 0x2e1   :  { %347 = vadd.xlane.f32.xlu0 %v346_v48 }
 0x2e2   :  { %v1473_v49 = vpop.eup %1472 }
 0x2e3   :  { %v1475_v50 = vpop.eup %1474  ;;  %v727_v51 = vsel %vm114_vm0, %v1473_v49, 0.0 }
 0x2e4   :  { %728 = vadd.xlane.f32.xlu1 %v727_v51  ;;  %v724_v52 = vsel %vm114_vm0, %v1475_v50, 0.0 }
 0x2e5   :  { %725 = vadd.xlane.f32.xlu0 %v724_v52 }
 0x2e6   :  { %v1477_v53 = vpop.eup %1476 }
 0x2e7   :  { %v1479_v54 = vpop.eup %1478  ;;  %v733_v55 = vsel %vm114_vm0, %v1477_v53, 0.0 }
 0x2e8   :  { %734 = vadd.xlane.f32.xlu1 %v733_v55  ;;  %v730_v56 = vsel %vm114_vm0, %v1479_v54, 0.0 }
 0x2e9   :  { %731 = vadd.xlane.f32.xlu0 %v730_v56 }
 0x2f9   :  { %873 = vperm.xlu1 %1463, %v871_v27   ;;  %v1041_v27 = vld [vmem:[%s1990_s12 + $0x18] sm:$0xff] }
 0x2ff   :  { %880 = vperm.xlu0 %1462, %v878_v57  }
 0x369   :  { %v345_v59 = vpop.xlane.xlu1 %344 }
 0x36a   :  { %v353_v60 = vmax.f32 %v345_v59, 1e-20  ;;  %v342_v61 = vpop.xlane.xlu0 %341 }
 0x36b   :  { %v352_v62 = vmax.f32 %v342_v61, 1e-20 }
 0x36c   :  { %1480 = vrcp.f32 %v353_v60 }
 0x36d   :  { %1482 = vrcp.f32 %v352_v62  ;;  %v351_v63 = vpop.xlane.xlu1 %350 }
 0x36e   :  { %v355_v0 = vmax.f32 %v351_v63, 1e-20  ;;  %v348_v1 = vpop.xlane.xlu0 %347 }
 0x36f   :  { %v354_v2 = vmax.f32 %v348_v1, 1e-20 }
 0x370   :  { %1484 = vrcp.f32 %v355_v0 }
 0x371   :  { %1486 = vrcp.f32 %v354_v2  ;;  %v729_v3 = vpop.xlane.xlu1 %728  ;;  %v870_v2 = vand.u32 127, %v288_v16 }
 0x372   :  { %v737_v4 = vmax.f32 %v729_v3, 1e-20  ;;  %v726_v5 = vpop.xlane.xlu0 %725 }
 0x373   :  { %v736_v6 = vmax.f32 %v726_v5, 1e-20 }
 0x374   :  { %1488 = vrcp.f32 %v737_v4 }
 0x375   :  { %1490 = vrcp.f32 %v736_v6  ;;  %v735_v7 = vpop.xlane.xlu1 %734 }
 0x376   :  { %v1481_v8 = vpop.eup %1480  ;;  %v739_v9 = vmax.f32 %v735_v7, 1e-20  ;;  %v732_v10 = vpop.xlane.xlu0 %731 }
 0x377   :  { %v1483_v11 = vpop.eup %1482  ;;  %v361_v12 = vmul.f32 %v1481_v8, %v1465_v38  ;;  %v738_v13 = vmax.f32 %v732_v10, 1e-20 }
 0x378   :  { %1492 = vrcp.f32 %v739_v9  ;;  %v360_v14 = vmul.f32 %v1483_v11, %v1467_v41 }
 0x379   :  { %1494 = vrcp.f32 %v738_v13  ;;  %v874_v3 = vpop.permute.xlu1 %873 }
 0x37a   :  { %v1485_v15 = vpop.eup %1484  ;;  %1319 = vmatprep.mubr.msk.f32.mxu1 %vm114_vm0, %v360_v14  ;;  %vm875_vm7 = vcmp.eq.s32.totalorder %v870_v2, %v874_v3 }
 0x37b   :  { %v1487_v17 = vpop.eup %1486  ;;  %1320 = vmatmul.mubr.msk.f32.vlgmr.msra.gmra.mrb[4].mxu1 %vm114_vm0, %v361_v12  ;;  %v363_v18 = vmul.f32 %v1485_v15, %v1469_v45 }
 0x37c   :  { %1421 = vmatpush3.bf16.msra.mxu1 %v1825_v30  ;;  %v362_v19 = vmul.f32 %v1487_v17, %v1471_v46 }
 0x37d   :  { %1423 = vmatprep.subr.bf16.mxu1 %v1831_v44 }
 0x37e   :  { %v1489_v20 = vpop.eup %1488  ;;  %1322 = vmatprep.mubr.msk.f32.mxu1 %vm114_vm0, %v362_v19 }
 0x37f   :  { %v1491_v21 = vpop.eup %1490  ;;  %v745_v22 = vmul.f32 %v1489_v20, %v1473_v49  ;;  %1323 = vmatmul.mubr.msk.f32.gmra.mrb[6].mxu1 %vm114_vm0, %v363_v18  ;;  %v881_v18 = vpop.permute.xlu0 %880 }
 0x380   :  { %1425 = vmatpush3.bf16.msra.mxu1 %v1831_v44  ;;  %v744_v23 = vmul.f32 %v1491_v21, %v1475_v50  ;;  %v1638_v44 = vmov 0.0   ;;  %vm882_vm12 = vcmp.eq.s32.totalorder %v870_v2, %v881_v18 }
 0x381   :  { %1432 = vmatprep.subr.bf16.mxu1 %v1636_v28  ;;  %1361 = vmatprep.mubr.msk.f32.mxu0 %vm1637_vm2, %v1638_v44  ;;  %v1238_v12 = vsel %vm875_vm7, 1.0, %v1638_v44 }
 0x382   :  { %v1493_v24 = vpop.eup %1492  ;;  %1347 = vmatprep.mubr.msk.f32.mxu1 %vm114_vm0, %v744_v23  ;;  %v1239_v23 = vsel %vm882_vm12, 1.0, %v1638_v44 }
 0x383   :  { %v1495_v25 = vpop.eup %1494  ;;  %1348 = vmatmul.mubr.msk.f32.vlgmr.msra.gmra.mrb[8].mxu1 %vm114_vm0, %v745_v22  ;;  %v747_v30 = vmul.f32 %v1493_v24, %v1477_v53  ;;  %v1038_v24 = vld [vmem:[%s1990_s12] sm:$0xff] }
 0x384   :  { %v746_v26 = vmul.f32 %v1495_v25, %v1479_v54  ;;  %v1039_v25 = vld [vmem:[%s1990_s12 + $0x8] sm:$0xff] }
 0x386   :  { %1350 = vmatprep.mubr.msk.f32.mxu1 %vm114_vm0, %v746_v26  ;;  %v1439_v26 = vpack.c.bf16 %v1039_v25, %v1038_v24 }
 0x387   :  { %1351 = vmatmul.mubr.msk.f32.gmra.mrb[10].mxu1 %vm114_vm0, %v747_v30  ;;  %v1040_v30 = vld [vmem:[%s1990_s12 + $0x10] sm:$0xff] }
 0x388   :  { %1372 = vmatprep.mubr.msk.f32.mxu1 %vm1637_vm2, %v1638_v44 }
 0x44e   :  { %v1321_v29 = vpop.f32.mrb[4].mxu1 }
 0x44f   :  { %v466_v31 = vmin.f32 %v1321_v29, 0.0  ;;  %v442_v32 = vpop.f32.mrb[5].mxu1  ;;  %vm462_vm3 = vcmp.gt.f32.partialorder %v1321_v29, 0.0 }
 0x450   :  { %v465_v33 = vmin.f32 %v442_v32, 0.0  ;;  %vm461_vm4 = vcmp.gt.f32.partialorder %v442_v32, 0.0 }
 0x451   :  { %v471_v34 = vmul.f32 1.442695, %v466_v31  ;;  %v1043_v31 = vld [vmem:[%s1990_s12 + $0x28] sm:$0xff] }
 0x452   :  { %v469_v35 = vmul.f32 1.442695, %v465_v33  ;;  %v1324_v36 = vpop.f32.mrb[6].mxu1  ;;  %v1044_v33 = vld [vmem:[%s1990_s12 + $0x30] sm:$0xff] }
 0x453   :  { %1496 = vpow2.f32 %v471_v34  ;;  %v468_v37 = vmin.f32 %v1324_v36, 0.0  ;;  %v452_v38 = vpop.f32.mrb[7].mxu1  ;;  %vm464_vm5 = vcmp.gt.f32.partialorder %v1324_v36, 0.0  ;;  %v1045_v34 = vld [vmem:[%s1990_s12 + $0x38] sm:$0xff] }
 0x454   :  { %1498 = vpow2.f32 %v469_v35  ;;  %v467_v39 = vmin.f32 %v452_v38, 0.0  ;;  %vm463_vm6 = vcmp.gt.f32.partialorder %v452_v38, 0.0  ;;  %v1448_v35 = vpack.c.bf16 %v1045_v34, %v1044_v33 }
 0x455   :  { %v475_v40 = vmul.f32 1.442695, %v468_v37 }
 0x456   :  { %v473_v41 = vmul.f32 1.442695, %v467_v39  ;;  %v1349_v42 = vpop.f32.mrb[8].mxu1 }
 0x457   :  { %1500 = vpow2.f32 %v475_v40  ;;  %v850_v43 = vmin.f32 %v1349_v42, 0.0  ;;  %v826_v45 = vpop.f32.mrb[9].mxu1  ;;  %vm846_vm8 = vcmp.gt.f32.partialorder %v1349_v42, 0.0 }
 0x458   :  { %1502 = vpow2.f32 %v473_v41  ;;  %v849_v46 = vmin.f32 %v826_v45, 0.0  ;;  %vm845_vm9 = vcmp.gt.f32.partialorder %v826_v45, 0.0 }
 0x459   :  { %v855_v47 = vmul.f32 1.442695, %v850_v43 }
 0x45a   :  { %v853_v48 = vmul.f32 1.442695, %v849_v46  ;;  %v1352_v49 = vpop.f32.mrb[10].mxu1  ;;  %v1244_v46 = vld [vmem:[%s1992_s14] ss:$0 sm:$0xff] }
 0x45b   :  { %1504 = vpow2.f32 %v855_v47  ;;  %v852_v50 = vmin.f32 %v1352_v49, 0.0  ;;  %v836_v51 = vpop.f32.mrb[11].mxu1  ;;  %vm848_vm10 = vcmp.gt.f32.partialorder %v1352_v49, 0.0 }
 0x45c   :  { %1506 = vpow2.f32 %v853_v48  ;;  %v851_v52 = vmin.f32 %v836_v51, 0.0  ;;  %vm847_vm11 = vcmp.gt.f32.partialorder %v836_v51, 0.0 }
 0x45d   :  { %v1497_v53 = vpop.eup %1496  ;;  %v859_v54 = vmul.f32 1.442695, %v852_v50  ;;  %v1245_v50 = vld [vmem:[#allocation2] ss:$0 sm:$0xff] }
 0x45e   :  { %v1499_v55 = vpop.eup %1498  ;;  %v1221_v56 = vadd.f32 -1.0, %v1497_v53  ;;  %v857_v57 = vmul.f32 1.442695, %v851_v52 }
 0x45f   :  { %v1220_v58 = vadd.f32 -1.0, %v1499_v55  ;;  %1508 = vpow2.f32 %v859_v54 }
 0x460   :  { %v482_v59 = vsel %vm462_vm3, %v1321_v29, %v1221_v56  ;;  %1510 = vpow2.f32 %v857_v57  ;;  %v1042_v29 = vld [vmem:[%s1990_s12 + $0x20] sm:$0xff] }
 0x461   :  { %v1501_v60 = vpop.eup %1500  ;;  %v481_v61 = vsel %vm461_vm4, %v442_v32, %v1220_v58  ;;  %v1445_v32 = vpack.c.bf16 %v1043_v31, %v1042_v29 }
 0x462   :  { %v1503_v62 = vpop.eup %1502  ;;  %v1427_v63 = vpack.c.bf16 %v482_v59, %v481_v61  ;;  %v1223_v0 = vadd.f32 -1.0, %v1501_v60 }
 0x463   :  { %v1222_v1 = vadd.f32 -1.0, %v1503_v62 }
 0x464   :  { %v484_v4 = vsel %vm464_vm5, %v1324_v36, %v1223_v0  ;;  %1428 = vmatpush3.bf16.msra.mxu0 %v1427_v63 }
 0x465   :  { %v1505_v5 = vpop.eup %1504  ;;  %v483_v6 = vsel %vm463_vm6, %v452_v38, %v1222_v1  ;;  %1429 = vmatprep.subr.bf16.mxu0 %v1636_v28 }
 0x466   :  { %v1507_v7 = vpop.eup %1506  ;;  %v1430_v8 = vpack.c.bf16 %v484_v4, %v483_v6  ;;  %v1235_v9 = vadd.f32 -1.0, %v1505_v5 }
 0x467   :  { %v1234_v10 = vadd.f32 -1.0, %v1507_v7 }
 0x468   :  { %v866_v11 = vsel %vm846_vm8, %v1349_v42, %v1235_v9  ;;  %1431 = vmatpush3.bf16.msra.mxu0 %v1430_v8  ;;  %v1242_v42 = vld [vmem:[%s1991_s13] ss:$0 sm:$0xff]  ;;  %s1578_s13 = scalar_lea.vmem %s1187_s21, 128 }
 0x469   :  { %v1509_v16 = vpop.eup %1508  ;;  %v865_v13 = vsel %vm845_vm9, %v826_v45, %v1234_v10  ;;  %1438 = vmatprep.subr.bf16.mxu0 %v1636_v28  ;;  %p1579_p10 = scmp.ne.s32.totalorder %s1187_s21, %s1578_s13  ;;  %p1584_p12 = scmp.lt.s32.totalorder %s1578_s13, %s1578_s13 }
 0x46a   :  { %v1511_v14 = vpop.eup %1510  ;;  %v1433_v15 = vpack.c.bf16 %v866_v11, %v865_v13  ;;  %v1237_v17 = vadd.f32 -1.0, %v1509_v16 }
 0x46b   :  { %v1236_v19 = vadd.f32 -1.0, %v1511_v14  ;;  %1362 = vmatmul.mubr.msk.f32.vlgmr.msra.gmra.mrb[4].mxu0 %vm114_vm0, %v1238_v12  ;;  %p1585_p13 = por %p1584_p12, %p1583_p11 }
 0x46c   :  { %v868_v20 = vsel %vm848_vm10, %v1352_v49, %v1237_v17  ;;  %1434 = vmatpush3.bf16.msra.mxu1 %v1433_v15  ;;  %1391 = vmatprep.mubr.msk.f32.mxu0 %vm1637_vm2, %v1638_v44  ;;  %v1442_v44 = vpack.c.bf16 %v1041_v27, %v1040_v30 }
 0x46d   :  { %v867_v21 = vsel %vm847_vm11, %v836_v51, %v1236_v19  ;;  %1435 = vmatprep.subr.bf16.mxu1 %v1636_v28  ;;  %1440 = vmatpush3.bf16.msra.mxu0 %v1439_v26  ;;  %p1586_p0 = pnand %p1585_p13, %p1579_p10 }
 0x46e   :  { %v1436_v22 = vpack.c.bf16 %v868_v20, %v867_v21  ;;  %1441 = vmatprep.subr.bf16.mxu0 %v1636_v28 }
 0x470   :  { %1437 = vmatpush3.bf16.msra.mxu1 %v1436_v22 }
 0x471   :  { %1443 = vmatpush3.bf16.msra.mxu0 %v1442_v44 }
 0x472   :  { %1444 = vmatprep.subr.bf16.mxu0 %v1636_v28 }
 0x473   :  { %1373 = vmatmul.mubr.msk.f32.vlgmr.msra.gmra.mrb[12].mxu1 %vm114_vm0, %v1239_v23 }
 0x475   :  { %1446 = vmatpush3.bf16.msra.mxu0 %v1445_v32 }
 0x476   :  { %1447 = vmatprep.subr.bf16.mxu0 %v1636_v28 }
 0x479   :  { %1449 = vmatpush3.bf16.msra.mxu0 %v1448_v35 }
 0x53e   :  { %v954_v36 = vpop.f32.mrb[4].mxu0 }
 0x53f   :  { %v1363_v37 = vpop.f32.mrb[5].mxu0 }
 0x546   :  { %v1027_v38 = vpop.f32.mrb[12].mxu1 }
 0x547   :  { %1032 = vrot.lane.b32.xlu1 %v1027_v38, %s1639_s24  ;;  %v1374_v39 = vpop.f32.mrb[13].mxu1 }
 0x5b9   :  { %v1033_v40 = vpop.permute.xlu1 %1032 }
 0x5ba   :  { %v1035_v41 = vsel %vm114_vm0, %v954_v36, %v1033_v40 }
 0x5bb   :  { %1392 = vmatmul.mubr.msk.f32.vlgmr.msra.gmra.mrb[6].mxu0 %vm1036_vm13, %v1035_v41  ;;  %1037 = vst.msk [vmem:[#allocation9] sm:$0xff] %vm1036_vm13, %v1035_v41 }
 0x68e   :  { %v1122_v43 = vpop.f32.mrb[6].mxu0 }
 0x68f   :  { %v1123_v45 = vadd.f32 %v1242_v42, %v1122_v43  ;;  %v1393_v28 = vpop.f32.mrb[7].mxu0 }
 0x691   :  { %v1126_v47 = vmax.f32 %v1123_v45, 0.0 }
 0x693   :  { %v1134_v48 = vmul.f32 %v1244_v46, %v1126_v47 }
 0x695   :  { %v1135_v49 = vsel %vm114_vm0, %v1134_v48, 0.0 }
 0x696   :  { %1136 = vadd.xlane.f32.xlu1 %v1135_v49 }
 0x723   :  { %v1137_v51 = vpop.xlane.xlu1 %1136 }
 0x724   :  { %v1145_v52 = vadd.f32 %v1245_v50, %v1137_v51 }
 0x726   :  { %1146 = vxpose.xlu0.b32.start.end [1/1] (short) (narrow) %v1145_v52, 8 }
 0x727   :  { %1589 = shalt.err (!%p1586_p0)
}
 0x728   :  { %s1590_s26 = scalar_lea.hbm %s1994_s16, 128 }
 0x729   :  { %p1591_p1 = scmp.ne.s32.totalorder %s1994_s16, %s1590_s26  ;;  %p1594_p2 = scmp.lt.u32.totalorder %s1590_s26, %s1994_s16 }
 0x72b   :  { %p1596_p3 = pnand %p1594_p2, %p1591_p1 }
 0x72d   :  { %1599 = shalt.err (!%p1596_p3)
}
 0x72e   :  { %1189 = dma.vmem_to_hbm [thread:$0]  %s1187_s21, 128, %s1994_s16, [#allocation5]   ;;  %vm1178_vm0 = vcmask 57344  }
 0x72f   :  { %s1641_s19 = smov [#allocation10]  }
 0x730   :  { %s1196_s5 = sshll.u32 %s1641_s19, 4  ;;  %s1197_s5 = int_to_ptr.vmem [resolvable:$true] %s1196_s5 }
 0x731   :  { %s1600_s29 = scalar_lea.vmem %s1197_s5, 16  ;;  %s1604_s1 = scalar_lea.vmem %s1197_s5, 32 }
 0x732   :  { %p1601_p4 = scmp.ne.s32.totalorder %s1197_s5, %s1600_s29  ;;  %p1605_p5 = scmp.lt.s32.totalorder %s1197_s5, %s1197_s5 }
 0x733   :  { %p1606_p6 = scmp.lt.s32.totalorder %s1604_s1, %s1600_s29 }
 0x735   :  { %p1607_p7 = por %p1606_p6, %p1605_p5 }
 0x737   :  { %p1608_p8 = pnand %p1607_p7, %p1601_p4 }
 0x7a6   :  { %v1162_v53 = vpop.trf.xlu0 }
 0x7a7   :  { %1179 = vst.msk [vmem:[#allocation10] sm:$0x1] %vm1178_vm0, %v1162_v53 }
 0x7a8   :  { %1611 = shalt.err (!%p1608_p8)
}
 0x7a9   :  { %s1612_s3 = scalar_lea.hbm %s1995_s17, 16 }
 0x7aa   :  { %p1613_p9 = scmp.ne.s32.totalorder %s1995_s17, %s1612_s3  ;;  %p1616_p10 = scmp.lt.u32.totalorder %s1612_s3, %s1995_s17 }
 0x7ac   :  { %p1618_p11 = pnand %p1616_p10, %p1613_p9 }
 0x7ae   :  { %1621 = shalt.err (!%p1618_p11)
}
 0x7af   :  { %1199 = dma.vmem_to_hbm [thread:$0]  %s1197_s5, 16, %s1995_s17, [#allocation11]  }
 0x7b0   :  { %1626 = dma.done.wait [#allocation5], 128  }
 0x7b1   :  { %1627 = vsyncadd [#allocation5], 4294967168 }
 0x7b2   :  { %1628 = dma.done.wait [#allocation11], 16  }
 0x7b3   :  { %1629 = vsyncadd [#allocation11], 4294967280 }
 0x7b4   :  { %1206 = vsyncpa [#allocation4], 1 }
 0x7b5   :  { %1207 = vsyncpa [#allocation7], 1 }
 0x7b6   :  { %1208 = vsyncpa [#allocation5], 1 }
 0x7b7   :  { %1209 = vsyncpa [#allocation11], 1 }

</bundles_post_ra>
